<compile_context>
chip_gen: v7x
topology: tpu7x:2x2x1
jax: 0.10.0
libtpu: 0.0.40
codegen_flags: <defaults>
</compile_context>

<pallas_src>
import functools

import jax
import jax.numpy as jnp
from jax import lax
from jax.experimental import pallas as pl
from jax.experimental.pallas import tpu as pltpu


def _normalize(x, scale, eps_sq):
    """Row-normalize x (f32) and multiply by `scale`; matches F.normalize."""
    x = x.astype(jnp.float32)
    sq = jnp.sum(x * x, axis=1, keepdims=True)
    # x / max(||x||, eps) == x * rsqrt(max(||x||^2, eps^2)); single EUP rsqrt.
    return x * (lax.rsqrt(jnp.maximum(sq, eps_sq)) * scale)


def _criterion_kernel(v_tile_ref, r_tile_ref, v_full_ref, r_full_ref,
                      loss_ref, v_scaled_ref, r_scaled_ref,
                      *, temperature, batch, matmul_dtype):
    step = pl.program_id(0)
    inv_temp = jnp.float32(1.0 / temperature)
    eps_sq = jnp.float32(1e-24)  # F.normalize eps=1e-12, applied on ||x||^2

    @pl.when(step == 0)
    def _init():
        loss_ref[0, 0] = jnp.float32(0.0)
        # Normalize + fold 1/temperature into the resident RHS operands once.
        v_scaled_ref[...] = _normalize(v_full_ref[...], inv_temp,
                                       eps_sq).astype(matmul_dtype)
        r_scaled_ref[...] = _normalize(r_full_ref[...], inv_temp,
                                       eps_sq).astype(matmul_dtype)

    # Normalize only this step's tile rows in f32 (cheap: tm x D).
    v_t = _normalize(v_tile_ref[...], 1.0, eps_sq)   # [tm, D] unit rows
    r_t = _normalize(r_tile_ref[...], 1.0, eps_sq)   # [tm, D] unit rows

    # Positive-pair logits (diagonal of the logits matrix), [tm, 1], f32.
    diag = jnp.sum(v_t * r_t, axis=1, keepdims=True) * inv_temp

    dn = (((1,), (1,)), ((), ()))  # contract dim 1 of both; no transpose.
    # v2r rows:  logits[tile, :]   = <v_i, r_j> / temperature   -> [tm, B]
    logits_v2r = lax.dot_general(v_t.astype(matmul_dtype), r_scaled_ref[...],
                                 dn, preferred_element_type=jnp.float32)
    # r2v rows:  logits.T[tile, :] = <r_i, v_j> / temperature   -> [tm, B]
    logits_r2v = lax.dot_general(r_t.astype(matmul_dtype), v_scaled_ref[...],
                                 dn, preferred_element_type=jnp.float32)

    def _row_lse(lg):  # lane-axis (fast) logsumexp -> [tm, 1]
        m = jnp.max(lg, axis=1, keepdims=True)
        s = jnp.sum(jnp.exp(lg - m), axis=1, keepdims=True)
        return jnp.log(s) + m

    # Per-row contribution to 2*B*loss: lse_row + lse_col - 2*diag.
    contrib = _row_lse(logits_v2r) + _row_lse(logits_r2v) - 2.0 * diag
    loss_ref[0, 0] += jnp.sum(contrib)

    @pl.when(step == pl.num_programs(0) - 1)
    def _finalize():
        loss_ref[0, 0] = loss_ref[0, 0] * (0.5 / batch)


def criterion_loss(vision_embed, region_embed, temperature=0.07, *,
                   row_tile=256, matmul_dtype=jnp.bfloat16,
                   vmem_limit_bytes=None):
    """Pallas TPU implementation of Criterion.forward.

    matmul_dtype=jnp.bfloat16 uses the MXU fast path on v6e/v7x (~1e-3 rel
    error on the loss); pass jnp.float32 for bit-closer numerics.
    """
    assert vision_embed.shape == region_embed.shape
    B, D = vision_embed.shape

    # Row tile: multiple of 8 that divides B, else fall back to the full batch.
    tm = row_tile if (row_tile % 8 == 0 and B % row_tile == 0) else B
    grid = (B // tm,)

    kernel = functools.partial(
        _criterion_kernel,
        temperature=float(temperature),
        batch=B,
        matmul_dtype=matmul_dtype,
    )

    out = pl.pallas_call(
        kernel,
        out_shape=jax.ShapeDtypeStruct((1, 1), jnp.float32),
        grid=grid,
        in_specs=[
            pl.BlockSpec((tm, D), lambda i: (i, 0)),  # vision rows (v2r slab)
            pl.BlockSpec((tm, D), lambda i: (i, 0)),  # region rows (r2v slab)
            pl.BlockSpec((B, D), lambda i: (0, 0)),   # vision full (resident)
            pl.BlockSpec((B, D), lambda i: (0, 0)),   # region full (resident)
        ],
        out_specs=pl.BlockSpec(memory_space=pltpu.MemorySpace.SMEM),
        scratch_shapes=[
            pltpu.VMEM((B, D), matmul_dtype),  # normalized/scaled vision
            pltpu.VMEM((B, D), matmul_dtype),  # normalized/scaled region
        ],
        compiler_params=pltpu.CompilerParams(
            # Grid axis accumulates into the shared scalar output -> reduction.
            dimension_semantics=("arbitrary",),
            vmem_limit_bytes=vmem_limit_bytes,
        ),
    )(vision_embed, region_embed, vision_embed, region_embed)
    return out[0, 0]


def _reference_loss(vision_embed, region_embed, temperature=0.07):
    """Pure-JAX reference for correctness checking."""
    v = vision_embed.astype(jnp.float32)
    r = region_embed.astype(jnp.float32)
    v = v / jnp.maximum(jnp.linalg.norm(v, axis=1, keepdims=True), 1e-12)
    r = r / jnp.maximum(jnp.linalg.norm(r, axis=1, keepdims=True), 1e-12)
    logits = (v @ r.T) / temperature
    labels = jnp.arange(logits.shape[0])

    def ce(lg):
        lse = jax.nn.logsumexp(lg, axis=1)
        return jnp.mean(lse - lg[jnp.arange(lg.shape[0]), labels])

    return (ce(logits) + ce(logits.T)) / 2.0


if __name__ == "__main__":
    key = jax.random.PRNGKey(0)
    k1, k2 = jax.random.split(key)

    # Small shapes consistent with the module: batch=8, embedding dim=32.
    B, D = 8, 32
    vision_embed = jax.random.normal(k1, (B, D), dtype=jnp.float32)
    region_embed = jax.random.normal(k2, (B, D), dtype=jnp.float32)

    ref = _reference_loss(vision_embed, region_embed, temperature=0.07)

    # f32-MXU path: tight tolerance vs. reference.
    loss_f32 = criterion_loss(vision_embed, region_embed, temperature=0.07,
                              matmul_dtype=jnp.float32)
    jax.block_until_ready(loss_f32)
    assert jnp.allclose(loss_f32, ref, atol=1e-4, rtol=1e-4), (loss_f32, ref)

    # bf16-MXU path (v6e/v7x fast path): looser tolerance.
    loss_bf16 = criterion_loss(vision_embed, region_embed, temperature=0.07,
                               matmul_dtype=jnp.bfloat16)
    jax.block_until_ready(loss_bf16)
    assert jnp.allclose(loss_bf16, ref, atol=5e-2, rtol=5e-2), (loss_bf16, ref)

    # Multi-tile grid path (B=16, row_tile=8) to exercise the accumulator and
    # step-0 scratch initialization across several grid iterations.
    k3, k4 = jax.random.split(k2)
    B2, D2 = 16, 32
    v2 = jax.random.normal(k3, (B2, D2), dtype=jnp.float32)
    r2 = jax.random.normal(k4, (B2, D2), dtype=jnp.float32)
    ref2 = _reference_loss(v2, r2, temperature=0.07)
    loss_tiled = criterion_loss(v2, r2, temperature=0.07, row_tile=8,
                                matmul_dtype=jnp.float32)
    jax.block_until_ready(loss_tiled)
    assert jnp.allclose(loss_tiled, ref2, atol=1e-4, rtol=1e-4), (loss_tiled, ref2)

    print("KERNEL_OK")
</pallas_src>

<mosaic_0001>
module attributes {stable_mosaic.version = 11 : i64} {
  func.func @_criterion_kernel(%arg0: i32, %arg1: memref<8x32xf32, #tpu.memory_space<vmem>>, %arg2: memref<8x32xf32, #tpu.memory_space<vmem>>, %arg3: memref<8x32xf32, #tpu.memory_space<vmem>>, %arg4: memref<8x32xf32, #tpu.memory_space<vmem>>, %arg5: memref<1x1xf32, #tpu.memory_space<smem>>, %arg6: memref<8x32xf32, #tpu.memory_space<vmem>>, %arg7: memref<8x32xf32, #tpu.memory_space<vmem>>) attributes {dimension_semantics = [#tpu.dimension_semantics<arbitrary>], iteration_bounds = array<i64: 1>, scalar_prefetch = 0 : i64, scratch_operands = 2 : i64, tpu.core_type = #tpu.core_type<tc>, window_params = [{transform_indices = @transform_0, window_bounds = array<i64: 8, 32>}, {transform_indices = @transform_1, window_bounds = array<i64: 8, 32>}, {pipeline_mode = #tpu.pipeline_mode<synchronous>, transform_indices = @transform_2, window_bounds = array<i64: 8, 32>}, {pipeline_mode = #tpu.pipeline_mode<synchronous>, transform_indices = @transform_3, window_bounds = array<i64: 8, 32>}, {transform_indices = @transform_4, window_bounds = array<i64: 1, 1>}]} {
    %c0_i32 = arith.constant 0 : i32
    %0 = arith.cmpi eq, %arg0, %c0_i32 : i32
    %1 = arith.extui %0 : i1 to i32
    %cst = arith.constant 1.000000e-24 : f32
    %cst_0 = arith.constant 14.2857141 : f32
    %c0_i32_1 = arith.constant 0 : i32
    %2 = arith.cmpi ne, %1, %c0_i32_1 : i32
    scf.if %2 {
      %cst_31 = arith.constant 0.000000e+00 : f32
      %c0_32 = arith.constant 0 : index
      %c0_33 = arith.constant 0 : index
      %66 = memref.load %arg5[%c0_32, %c0_33] : memref<1x1xf32, #tpu.memory_space<smem>>
      memref.store %cst_31, %arg5[%c0_32, %c0_33] : memref<1x1xf32, #tpu.memory_space<smem>>
      %c0_34 = arith.constant 0 : index
      %c0_35 = arith.constant 0 : index
      %67 = vector.load %arg3[%c0_34, %c0_35] : memref<8x32xf32, #tpu.memory_space<vmem>>, vector<8x32xf32>
      %68 = arith.mulf %67, %67 : vector<8x32xf32>
      %cst_36 = arith.constant dense<0.000000e+00> : vector<8xf32>
      %69 = vector.multi_reduction <add>, %68, %cst_36 [1] : vector<8x32xf32> to vector<8xf32>
      %70 = vector.shape_cast %69 : vector<8xf32> to vector<8x1xf32>
      %71 = vector.broadcast %cst : f32 to vector<8x1xf32>
      %72 = arith.maximumf %70, %71 : vector<8x1xf32>
      %73 = math.rsqrt %72 : vector<8x1xf32>
      %74 = vector.broadcast %cst_0 : f32 to vector<8x1xf32>
      %75 = arith.mulf %73, %74 : vector<8x1xf32>
      %76 = vector.broadcast %75 : vector<8x1xf32> to vector<8x32xf32>
      %77 = arith.mulf %67, %76 : vector<8x32xf32>
      %c0_37 = arith.constant 0 : index
      %c0_38 = arith.constant 0 : index
      %78 = vector.load %arg6[%c0_37, %c0_38] : memref<8x32xf32, #tpu.memory_space<vmem>>, vector<8x32xf32>
      tpu.vector_store %arg6[%c0_37, %c0_38], %77 {strides = array<i32>} : memref<8x32xf32, #tpu.memory_space<vmem>>, vector<8x32xf32>,
      %c0_39 = arith.constant 0 : index
      %c0_40 = arith.constant 0 : index
      %79 = vector.load %arg4[%c0_39, %c0_40] : memref<8x32xf32, #tpu.memory_space<vmem>>, vector<8x32xf32>
      %80 = arith.mulf %79, %79 : vector<8x32xf32>
      %cst_41 = arith.constant dense<0.000000e+00> : vector<8xf32>
      %81 = vector.multi_reduction <add>, %80, %cst_41 [1] : vector<8x32xf32> to vector<8xf32>
      %82 = vector.shape_cast %81 : vector<8xf32> to vector<8x1xf32>
      %83 = vector.broadcast %cst : f32 to vector<8x1xf32>
      %84 = arith.maximumf %82, %83 : vector<8x1xf32>
      %85 = math.rsqrt %84 : vector<8x1xf32>
      %86 = vector.broadcast %cst_0 : f32 to vector<8x1xf32>
      %87 = arith.mulf %85, %86 : vector<8x1xf32>
      %88 = vector.broadcast %87 : vector<8x1xf32> to vector<8x32xf32>
      %89 = arith.mulf %79, %88 : vector<8x32xf32>
      %c0_42 = arith.constant 0 : index
      %c0_43 = arith.constant 0 : index
      %90 = vector.load %arg7[%c0_42, %c0_43] : memref<8x32xf32, #tpu.memory_space<vmem>>, vector<8x32xf32>
      tpu.vector_store %arg7[%c0_42, %c0_43], %89 {strides = array<i32>} : memref<8x32xf32, #tpu.memory_space<vmem>>, vector<8x32xf32>,
    } else {
    }
    %c0 = arith.constant 0 : index
    %c0_2 = arith.constant 0 : index
    %3 = vector.load %arg1[%c0, %c0_2] : memref<8x32xf32, #tpu.memory_space<vmem>>, vector<8x32xf32>
    %4 = arith.mulf %3, %3 : vector<8x32xf32>
    %cst_3 = arith.constant dense<0.000000e+00> : vector<8xf32>
    %5 = vector.multi_reduction <add>, %4, %cst_3 [1] : vector<8x32xf32> to vector<8xf32>
    %6 = vector.shape_cast %5 : vector<8xf32> to vector<8x1xf32>
    %cst_4 = arith.constant 1.000000e-24 : f32
    %7 = vector.broadcast %cst_4 : f32 to vector<8x1xf32>
    %8 = arith.maximumf %6, %7 : vector<8x1xf32>
    %9 = math.rsqrt %8 : vector<8x1xf32>
    %cst_5 = arith.constant 1.000000e+00 : f32
    %10 = vector.broadcast %cst_5 : f32 to vector<8x1xf32>
    %11 = arith.mulf %9, %10 : vector<8x1xf32>
    %12 = vector.broadcast %11 : vector<8x1xf32> to vector<8x32xf32>
    %13 = arith.mulf %3, %12 : vector<8x32xf32>
    %c0_6 = arith.constant 0 : index
    %c0_7 = arith.constant 0 : index
    %14 = vector.load %arg2[%c0_6, %c0_7] : memref<8x32xf32, #tpu.memory_space<vmem>>, vector<8x32xf32>
    %15 = arith.mulf %14, %14 : vector<8x32xf32>
    %cst_8 = arith.constant dense<0.000000e+00> : vector<8xf32>
    %16 = vector.multi_reduction <add>, %15, %cst_8 [1] : vector<8x32xf32> to vector<8xf32>
    %17 = vector.shape_cast %16 : vector<8xf32> to vector<8x1xf32>
    %cst_9 = arith.constant 1.000000e-24 : f32
    %18 = vector.broadcast %cst_9 : f32 to vector<8x1xf32>
    %19 = arith.maximumf %17, %18 : vector<8x1xf32>
    %20 = math.rsqrt %19 : vector<8x1xf32>
    %cst_10 = arith.constant 1.000000e+00 : f32
    %21 = vector.broadcast %cst_10 : f32 to vector<8x1xf32>
    %22 = arith.mulf %20, %21 : vector<8x1xf32>
    %23 = vector.broadcast %22 : vector<8x1xf32> to vector<8x32xf32>
    %24 = arith.mulf %14, %23 : vector<8x32xf32>
    %25 = arith.mulf %13, %24 : vector<8x32xf32>
    %cst_11 = arith.constant dense<0.000000e+00> : vector<8xf32>
    %26 = vector.multi_reduction <add>, %25, %cst_11 [1] : vector<8x32xf32> to vector<8xf32>
    %27 = vector.shape_cast %26 : vector<8xf32> to vector<8x1xf32>
    %cst_12 = arith.constant 14.2857141 : f32
    %28 = vector.broadcast %cst_12 : f32 to vector<8x1xf32>
    %29 = arith.mulf %27, %28 : vector<8x1xf32>
    %c0_13 = arith.constant 0 : index
    %c0_14 = arith.constant 0 : index
    %30 = vector.load %arg7[%c0_13, %c0_14] : memref<8x32xf32, #tpu.memory_space<vmem>>, vector<8x32xf32>
    %cst_15 = arith.constant dense<0.000000e+00> : vector<8x8xf32>
    %31 = tpu.matmul %13, %30, %cst_15 {dimension_numbers = #tpu.dot_dimension_numbers<[1], [1], [0], [0], [0, 0, 1, 0], [], []>} : vector<8x32xf32>, vector<8x32xf32>, vector<8x8xf32> -> vector<8x8xf32>
    %c0_16 = arith.constant 0 : index
    %c0_17 = arith.constant 0 : index
    %32 = vector.load %arg6[%c0_16, %c0_17] : memref<8x32xf32, #tpu.memory_space<vmem>>, vector<8x32xf32>
    %cst_18 = arith.constant dense<0.000000e+00> : vector<8x8xf32>
    %33 = tpu.matmul %24, %32, %cst_18 {dimension_numbers = #tpu.dot_dimension_numbers<[1], [1], [0], [0], [0, 0, 1, 0], [], []>} : vector<8x32xf32>, vector<8x32xf32>, vector<8x8xf32> -> vector<8x8xf32>
    %cst_19 = arith.constant dense<0xFF800000> : vector<8xf32>
    %34 = vector.multi_reduction <maximumf>, %31, %cst_19 [1] : vector<8x8xf32> to vector<8xf32>
    %35 = vector.shape_cast %34 : vector<8xf32> to vector<8x1xf32>
    %36 = vector.broadcast %35 : vector<8x1xf32> to vector<8x8xf32>
    %37 = arith.subf %31, %36 : vector<8x8xf32>
    %38 = math.exp %37 : vector<8x8xf32>
    %cst_20 = arith.constant dense<0.000000e+00> : vector<8xf32>
    %39 = vector.multi_reduction <add>, %38, %cst_20 [1] : vector<8x8xf32> to vector<8xf32>
    %40 = vector.shape_cast %39 : vector<8xf32> to vector<8x1xf32>
    %41 = math.log %40 : vector<8x1xf32>
    %42 = arith.addf %41, %35 : vector<8x1xf32>
    %cst_21 = arith.constant dense<0xFF800000> : vector<8xf32>
    %43 = vector.multi_reduction <maximumf>, %33, %cst_21 [1] : vector<8x8xf32> to vector<8xf32>
    %44 = vector.shape_cast %43 : vector<8xf32> to vector<8x1xf32>
    %45 = vector.broadcast %44 : vector<8x1xf32> to vector<8x8xf32>
    %46 = arith.subf %33, %45 : vector<8x8xf32>
    %47 = math.exp %46 : vector<8x8xf32>
    %cst_22 = arith.constant dense<0.000000e+00> : vector<8xf32>
    %48 = vector.multi_reduction <add>, %47, %cst_22 [1] : vector<8x8xf32> to vector<8xf32>
    %49 = vector.shape_cast %48 : vector<8xf32> to vector<8x1xf32>
    %50 = math.log %49 : vector<8x1xf32>
    %51 = arith.addf %50, %44 : vector<8x1xf32>
    %52 = arith.addf %42, %51 : vector<8x1xf32>
    %cst_23 = arith.constant 2.000000e+00 : f32
    %53 = vector.broadcast %cst_23 : f32 to vector<8x1xf32>
    %54 = arith.mulf %53, %29 : vector<8x1xf32>
    %55 = arith.subf %52, %54 : vector<8x1xf32>
    %c0_24 = arith.constant 0 : index
    %c0_25 = arith.constant 0 : index
    %56 = memref.load %arg5[%c0_24, %c0_25] : memref<1x1xf32, #tpu.memory_space<smem>>
    %57 = vector.shape_cast %55 : vector<8x1xf32> to vector<1x8x1xf32>
    %cst_26 = arith.constant dense<0.000000e+00> : vector<1xf32>
    %58 = vector.multi_reduction <add>, %57, %cst_26 [1, 2] : vector<1x8x1xf32> to vector<1xf32>
    %59 = vector.shape_cast %58 : vector<1xf32> to vector<1x1x1xf32>
    %60 = vector.extract %59[0, 0, 0] : f32 from vector<1x1x1xf32>
    %61 = arith.addf %56, %60 : f32
    %c0_27 = arith.constant 0 : index
    %c0_28 = arith.constant 0 : index
    %62 = memref.load %arg5[%c0_27, %c0_28] : memref<1x1xf32, #tpu.memory_space<smem>>
    memref.store %61, %arg5[%c0_27, %c0_28] : memref<1x1xf32, #tpu.memory_space<smem>>
    %c0_i32_29 = arith.constant 0 : i32
    %63 = arith.cmpi eq, %arg0, %c0_i32_29 : i32
    %64 = arith.extui %63 : i1 to i32
    %c0_i32_30 = arith.constant 0 : i32
    %65 = arith.cmpi ne, %64, %c0_i32_30 : i32
    scf.if %65 {
      %c0_31 = arith.constant 0 : index
      %c0_32 = arith.constant 0 : index
      %66 = memref.load %arg5[%c0_31, %c0_32] : memref<1x1xf32, #tpu.memory_space<smem>>
      %cst_33 = arith.constant 6.250000e-02 : f32
      %67 = arith.mulf %66, %cst_33 : f32
      %c0_34 = arith.constant 0 : index
      %c0_35 = arith.constant 0 : index
      %68 = memref.load %arg5[%c0_34, %c0_35] : memref<1x1xf32, #tpu.memory_space<smem>>
      memref.store %67, %arg5[%c0_34, %c0_35] : memref<1x1xf32, #tpu.memory_space<smem>>
    } else {
    }
    return
  }
  func.func @transform_0(%arg0: i32) -> (i32, i32) {
    %c0_i32 = arith.constant 0 : i32
    %c0_i32_0 = arith.constant 0 : i32
    return %arg0, %c0_i32 : i32, i32
  }
  func.func @transform_1(%arg0: i32) -> (i32, i32) {
    %c0_i32 = arith.constant 0 : i32
    %c0_i32_0 = arith.constant 0 : i32
    return %arg0, %c0_i32 : i32, i32
  }
  func.func @transform_2(%arg0: i32) -> (i32, i32) {
    %c0_i32 = arith.constant 0 : i32
    %c0_i32_0 = arith.constant 0 : i32
    %c0_i32_1 = arith.constant 0 : i32
    return %c0_i32, %c0_i32_0 : i32, i32
  }
  func.func @transform_3(%arg0: i32) -> (i32, i32) {
    %c0_i32 = arith.constant 0 : i32
    %c0_i32_0 = arith.constant 0 : i32
    %c0_i32_1 = arith.constant 0 : i32
    return %c0_i32, %c0_i32_0 : i32, i32
  }
  func.func @transform_4(%arg0: i32) -> (i32, i32) {
    %c0_i32 = arith.constant 0 : i32
    %c0_i32_0 = arith.constant 0 : i32
    %c0_i32_1 = arith.constant 0 : i32
    return %c0_i32, %c0_i32_0 : i32, i32
  }
}

</mosaic_0001>

<bundles_post_ra>
// kernel: tpu_custom_call.1
= control target key start
LH: loop header
LB: loop body
LE: loop exit
PB: predicated region body
PF: predicated region fallthrough
CT: control target
= control target key end

     0   :  { %9 = vsyncpa [#allocation5], 0  ;;  %s542_s0 = inlined_call_operand.hbm [shape: f32[8,32], index: 0, kind: input, shape index: {}]   ;;  %s543_s1 = inlined_call_operand.hbm [shape: f32[8,32], index: 1, kind: input, shape index: {}]   ;;  %s544_s2 = inlined_call_operand.hbm [shape: f32[8,32], index: 2, kind: input, shape index: {}]   ;;  %s545_s3 = inlined_call_operand.vmem [shape: f32[8,32], index: 3, kind: input, shape index: {}]   ;;  %s546_s4 = inlined_call_operand.hbm [shape: f32[1,1], index: 4, kind: output, shape index: {}]  }
   0x1   :  { %10 = vsyncpa [#allocation8], 0 }
   0x2   :  { %11 = vsyncpa [#allocation6], 0  ;;  %s445_s15 = smov [#allocation7]   ;;  %s446_s17 = smov [#allocation4]  }
   0x3   :  { %s28_s16 = sshll.u32 %s445_s15, 4  ;;  %s18_s18 = sshll.u32 %s446_s17, 4  ;;  %s29_s16 = int_to_ptr.vmem [resolvable:$true] %s28_s16  ;;  %s19_s18 = int_to_ptr.vmem [resolvable:$true] %s18_s18 }
   0x4   :  { %s363_s21 = scalar_lea.hbm %s543_s1, 128 }
   0x5   :  { %p364_p0 = scmp.ne.s32.totalorder %s543_s1, %s363_s21  ;;  %p367_p1 = scmp.lt.u32.totalorder %s363_s21, %s543_s1 }
   0x7   :  { %p369_p2 = pnand %p367_p1, %p364_p0 }
   0x9   :  { %372 = shalt.err (!%p369_p2)
}
   0xa   :  { %s373_s26 = scalar_lea.vmem %s29_s16, 128  ;;  %p378_p4 = scmp.lt.s32.totalorder %s29_s16, %s29_s16 }
   0xb   :  { %p374_p3 = scmp.ne.s32.totalorder %s29_s16, %s373_s26  ;;  %p379_p5 = scmp.lt.s32.totalorder %s373_s26, %s373_s26 }
   0xd   :  { %p380_p6 = por %p379_p5, %p378_p4 }
   0xf   :  { %p381_p7 = pnand %p380_p6, %p374_p3 }
  0x11   :  { %384 = shalt.err (!%p381_p7)
}
  0x12   :  { %31 = dma.hbm_to_vmem [thread:$0]  %s543_s1, 128, %s29_s16, [#allocation8]  }
  0x13   :  { %s385_s5 = scalar_lea.hbm %s542_s0, 128 }
  0x14   :  { %p386_p8 = scmp.ne.s32.totalorder %s542_s0, %s385_s5  ;;  %p389_p9 = scmp.lt.u32.totalorder %s385_s5, %s542_s0 }
  0x16   :  { %p391_p10 = pnand %p389_p9, %p386_p8 }
  0x18   :  { %394 = shalt.err (!%p391_p10)
}
  0x19   :  { %s395_s10 = scalar_lea.vmem %s19_s18, 128  ;;  %p400_p12 = scmp.lt.s32.totalorder %s19_s18, %s19_s18 }
  0x1a   :  { %p396_p11 = scmp.ne.s32.totalorder %s19_s18, %s395_s10  ;;  %p401_p13 = scmp.lt.s32.totalorder %s395_s10, %s395_s10 }
  0x1c   :  { %p402_p0 = por %p401_p13, %p400_p12 }
  0x1e   :  { %p403_p1 = pnand %p402_p0, %p396_p11 }
  0x20   :  { %406 = shalt.err (!%p403_p1)
}
  0x21   :  { %21 = dma.hbm_to_vmem [thread:$0]  %s542_s0, 128, %s19_s18, [#allocation5]  }
  0x22   :  { %s447_s12 = smov [#allocation9]   ;;  %s407_s16 = scalar_lea.hbm %s544_s2, 128 }
  0x23   :  { %s38_s13 = sshll.u32 %s447_s12, 4  ;;  %p408_p2 = scmp.ne.s32.totalorder %s544_s2, %s407_s16  ;;  %s39_s13 = int_to_ptr.vmem [resolvable:$true] %s38_s13 }
  0x24   :  { %p411_p3 = scmp.lt.u32.totalorder %s407_s16, %s544_s2 }
  0x26   :  { %p413_p4 = pnand %p411_p3, %p408_p2 }
  0x28   :  { %416 = shalt.err (!%p413_p4)
}
  0x29   :  { %s417_s22 = scalar_lea.vmem %s39_s13, 128  ;;  %p422_p6 = scmp.lt.s32.totalorder %s39_s13, %s39_s13 }
  0x2a   :  { %p418_p5 = scmp.ne.s32.totalorder %s39_s13, %s417_s22  ;;  %p423_p7 = scmp.lt.s32.totalorder %s417_s22, %s417_s22 }
  0x2c   :  { %p424_p8 = por %p423_p7, %p422_p6 }
  0x2e   :  { %p425_p9 = pnand %p424_p8, %p418_p5 }
  0x30   :  { %428 = shalt.err (!%p425_p9)
}
  0x31   :  { %41 = dma.hbm_to_vmem [thread:$0]  %s544_s2, 128, %s39_s13, [#allocation8]  }
  0x32   :  { %439 = dma.done.wait [#allocation5], 128  }
  0x33   :  { %440 = vsyncadd [#allocation5], 4294967168 }
  0x34   :  { %441 = dma.done.wait [#allocation8], 256  }
  0x35   :  { %442 = vsyncadd [#allocation8], 4294967040  ;;  %v59_v0 = vld [vmem:[#allocation9] sm:$0xff]  ;;  %vm61_vm0 = vcmask 261120   ;;  %v80_v2 = vld [vmem:[#allocation4] sm:$0xff]  ;;  %v448_v12 = vmov 0.0  }
  0x36   :  { %v70_v1 = vld [vmem:[%s545_s3] sm:$0xff]  ;;  %v60_v3 = vmul.f32 %v59_v0, %v59_v0  ;;  %v81_v5 = vmul.f32 %v80_v2, %v80_v2  ;;  %v89_v6 = vld [vmem:[#allocation7] sm:$0xff]  ;;  %333 = vmatprep.subr.mxu1 %v448_v12  ;;  %328 = vmatprep.subr.mxu0 %v448_v12  ;;  %vm449_vm1 = vmmov 0   ;;  %vm256_vm2 = vcmask 64512   ;;  %s429_s27 = scalar_lea.hbm %s546_s4, 16 }
  0x37   :  { %v71_v4 = vmul.f32 %v70_v1, %v70_v1  ;;  %v90_v7 = vmul.f32 %v89_v6, %v89_v6  ;;  %335 = vmatprep.mubr.msk.f32.mxu1 %vm449_vm1, %v448_v12  ;;  %330 = vmatprep.mubr.msk.f32.mxu0 %vm449_vm1, %v448_v12  ;;  %vm285_vm3 = vcmask 7168   ;;  %p430_p10 = scmp.ne.s32.totalorder %s546_s4, %s429_s27  ;;  %p433_p11 = scmp.lt.u32.totalorder %s429_s27, %s546_s4 }
  0x38   :  { %v62_v8 = vsel %vm61_vm0, %v60_v3, 0.0  ;;  %v83_v9 = vsel %vm61_vm0, %v81_v5, 0.0 }
  0x39   :  { %63 = vadd.xlane.f32.xlu0 %v62_v8  ;;  %84 = vadd.xlane.f32.xlu1 %v83_v9  ;;  %v72_v10 = vsel %vm61_vm0, %v71_v4, 0.0  ;;  %v91_v11 = vsel %vm61_vm0, %v90_v7, 0.0  ;;  %p435_p12 = pnand %p433_p11, %p430_p10 }
  0x3d   :  { %73 = vadd.xlane.f32.xlu0 %v72_v10  ;;  %92 = vadd.xlane.f32.xlu1 %v91_v11 }
  0xc6   :  { %v64_v13 = vpop.xlane.xlu0 %63  ;;  %v85_v14 = vpop.xlane.xlu1 %84 }
  0xc7   :  { %v65_v15 = vmax.f32 %v64_v13, 1e-24  ;;  %v86_v16 = vmax.f32 %v85_v14, 1e-24 }
  0xc9   :  { %347 = vrsqrt.f32 %v65_v15 }
  0xca   :  { %v74_v17 = vpop.xlane.xlu0 %73  ;;  %349 = vrsqrt.f32 %v86_v16  ;;  %v93_v18 = vpop.xlane.xlu1 %92 }
  0xcb   :  { %v75_v19 = vmax.f32 %v74_v17, 1e-24  ;;  %v94_v20 = vmax.f32 %v93_v18, 1e-24 }
  0xcd   :  { %351 = vrsqrt.f32 %v75_v19 }
  0xce   :  { %353 = vrsqrt.f32 %v94_v20 }
  0xd3   :  { %v348_v21 = vpop.eup %347 }
  0xd4   :  { %v350_v22 = vpop.eup %349  ;;  %v67_v23 = vmul.f32 14.285714, %v348_v21 }
  0xd5   :  { %v88_v26 = vmul.f32 %v350_v22, %v80_v2 }
  0xd6   :  { %v68_v24 = vmul.f32 %v67_v23, %v59_v0 }
  0xd7   :  { %v352_v25 = vpop.eup %351 }
  0xd8   :  { %v354_v27 = vpop.eup %353  ;;  %69 = vst.msk [vmem:[#allocation2] sm:$0xff] %vm61_vm0, %v68_v24  ;;  %v77_v28 = vmul.f32 14.285714, %v352_v25 }
  0xd9   :  { %v96_v29 = vmul.f32 %v354_v27, %v89_v6 }
  0xda   :  { %v78_v30 = vmul.f32 %v77_v28, %v70_v1 }
  0xdb   :  { %v97_v31 = vmul.f32 %v96_v29, %v88_v26 }
  0xdc   :  { %79 = vst.msk [vmem:[#allocation3] sm:$0xff] %vm61_vm0, %v78_v30 }
  0xdd   :  { %v98_v50 = vsel %vm61_vm0, %v97_v31, 0.0 }
  0xdf   :  { %v179_v32 = vld [vmem:[#allocation2] sm:$0xff] }
  0xe0   :  { %334 = vmatpush3.xpose.msk.msra.mxu1 %vm61_vm0, %v179_v32 }
  0xe3   :  { %336 = vmatmul.mubr.msk.f32.vlgmr.msra.gmra.mrb[0].mxu1 %vm61_vm0, %v96_v29  ;;  %v102_v33 = vld [vmem:[#allocation3] sm:$0xff] }
  0xe4   :  { %329 = vmatpush3.xpose.msk.msra.mxu0 %vm61_vm0, %v102_v33 }
  0xe7   :  { %331 = vmatmul.mubr.msk.f32.vlgmr.msra.gmra.mrb[0].mxu0 %vm61_vm0, %v88_v26 }
 0x1b6   :  { %v252_v34 = vpop.f32.mrb[0].mxu1 }
 0x1b7   :  { %v269_v35 = vsel %vm256_vm2, %v252_v34, -inf  ;;  %v337_v36 = vpop.f32.mrb[1].mxu1 }
 0x1b8   :  { %270 = vmax.xlane.f32.xlu1 %v269_v35 }
 0x1ba   :  { %v175_v37 = vpop.f32.mrb[0].mxu0 }
 0x1bb   :  { %v332_v38 = vpop.f32.mrb[1].mxu0  ;;  %v257_v39 = vsel %vm256_vm2, %v175_v37, -inf }
 0x1bc   :  { %258 = vmax.xlane.f32.xlu0 %v257_v39 }
 0x245   :  { %v271_v40 = vpop.xlane.xlu1 %270 }
 0x246   :  { %v272_v41 = vsub.f32 %v252_v34, %v271_v40 }
 0x248   :  { %v273_v42 = vmul.f32 1.442695, %v272_v41 }
 0x249   :  { %v259_v43 = vpop.xlane.xlu0 %258 }
 0x24a   :  { %355 = vpow2.f32 %v273_v42  ;;  %v260_v44 = vsub.f32 %v175_v37, %v259_v43 }
 0x24c   :  { %v261_v45 = vmul.f32 1.442695, %v260_v44 }
 0x24e   :  { %357 = vpow2.f32 %v261_v45 }
 0x254   :  { %v356_v46 = vpop.eup %355 }
 0x255   :  { %v275_v47 = vsel %vm256_vm2, %v356_v46, 0.0 }
 0x256   :  { %276 = vadd.xlane.f32.xlu1 %v275_v47 }
 0x258   :  { %v358_v48 = vpop.eup %357 }
 0x259   :  { %v263_v49 = vsel %vm256_vm2, %v358_v48, 0.0 }
 0x25a   :  { %264 = vadd.xlane.f32.xlu0 %v263_v49 }
 0x25e   :  { %99 = vadd.xlane.f32.xlu0 %v98_v50 }
 0x2e3   :  { %v277_v51 = vpop.xlane.xlu1 %276 }
 0x2e4   :  { %359 = vlog2.f32 %v277_v51 }
 0x2e7   :  { %v265_v52 = vpop.xlane.xlu0 %264 }
 0x2e8   :  { %361 = vlog2.f32 %v265_v52 }
 0x2eb   :  { %v100_v54 = vpop.xlane.xlu0 %99 }
 0x2ec   :  { %v101_v58 = vmul.f32 14.285714, %v100_v54 }
 0x2ee   :  { %v360_v53 = vpop.eup %359  ;;  %v282_v62 = vmul.f32 2.0, %v101_v58 }
 0x2ef   :  { %v279_v55 = vmul.f32 0.6931472, %v360_v53 }
 0x2f1   :  { %v280_v59 = vadd.f32 %v279_v55, %v271_v40 }
 0x2f2   :  { %v362_v56 = vpop.eup %361 }
 0x2f3   :  { %v267_v57 = vmul.f32 0.6931472, %v362_v56 }
 0x2f5   :  { %v268_v60 = vadd.f32 %v267_v57, %v259_v43 }
 0x2f7   :  { %v281_v61 = vadd.f32 %v280_v59, %v268_v60 }
 0x2f9   :  { %v283_v63 = vsub.f32 %v281_v61, %v282_v62 }
 0x2fb   :  { %v286_v0 = vsel %vm285_vm3, %v283_v63, 0.0 }
 0x2fc   :  { %287 = vadd.xlane.f32.xlu1 %v286_v0 }
 0x389   :  { %v288_v1 = vpop.xlane.xlu1 %287 }
 0x38a   :  { %v289_v2 = vrot.slane %v288_v1, 4 }
 0x38c   :  { %v290_v3 = vadd.f32 %v289_v2, %v288_v1 }
 0x38e   :  { %v291_v4 = vrot.slane %v290_v3, 2 }
 0x390   :  { %v292_v5 = vadd.f32 %v291_v4, %v290_v3 }
 0x392   :  { %v293_v6 = vrot.slane %v292_v5, 1 }
 0x394   :  { %v294_v7 = vadd.f32 %v293_v6, %v292_v5 }
 0x396   :  { %338 = vpush %v294_v7 }
 0x3c7   :  { %s339_s2 = spop %338 }
 0x3c8   :  { %s303_s3 = smul.f32 0.0625, %s339_s2 }
 0x3ca   :  { %304 = sst [smem:[#allocation10]] %s303_s3 }
 0x3cb   :  { %438 = shalt.err (!%p435_p12)
}
 0x3cc   :  { %s450_s6 = smov [#allocation10]  }
 0x3cd   :  { %312 = dma.smem_to_hbm %s450_s6, 16, %s546_s4, [#allocation6]  }
 0x3ce   :  { %443 = dma.done.wait [#allocation6], 16  }
 0x3cf   :  { %444 = vsyncadd [#allocation6], 4294967280 }
 0x3d0   :  { %316 = sfence }
 0x3d1   :  { %317 = vsyncpa [#allocation5], 1 }
 0x3d2   :  { %318 = vsyncpa [#allocation8], 1 }
 0x3d3   :  { %319 = vsyncpa [#allocation6], 1 }

</bundles_post_ra>
